<compile_context>
chip_gen: v5e
topology: v5e:2x2
jax: 0.10.0
libtpu: 0.0.40
codegen_flags: <defaults>
</compile_context>

<pallas_src>
import functools

import jax
import jax.numpy as jnp
from jax import lax
from jax.experimental import pallas as pl
from jax.experimental.pallas import tpu as pltpu


def _max_identity(dtype):
    dtype = jnp.dtype(dtype)
    if jnp.issubdtype(dtype, jnp.floating):
        return float("-inf")
    return int(jnp.iinfo(dtype).min)


def _global_max_pool1d_kernel(x_ref, o_ref, *, length, tile_l, need_mask, fill):
    l_idx = pl.program_id(1)

    tile = x_ref[...]  # (TN, C, TL) in VMEM
    if need_mask:
        # Mask positions past the true length so padded garbage can't win the max.
        pos = l_idx * tile_l + lax.broadcasted_iota(jnp.int32, tile.shape, 2)
        tile = jnp.where(pos < length, tile, fill)

    # Per-tile reduction over the length (lane) axis -> lane-dense (TN, C).
    tile_max = jnp.max(tile, axis=-1)

    @pl.when(l_idx == 0)
    def _init():
        o_ref[...] = tile_max

    @pl.when(l_idx != 0)
    def _accum():
        o_ref[...] = jnp.maximum(o_ref[...], tile_max)


def global_max_pool1d(x, *, tile_l=None):
    """Equivalent of torch.max_pool1d(x, kernel_size=x.shape[-1]).

    x: (N, C, L) -> (N, C, 1)
    """
    N, C, L = x.shape
    itemsize = jnp.dtype(x.dtype).itemsize

    # Rows of N per grid step (sublane axis of the 2-D output block): must be a
    # multiple of 8 or the full extent N.
    tn = N if N < 8 else 8

    if tile_l is None:
        # Largest 128-aligned TL such that one (TN, C, TL) input tile stays
        # under ~8 MiB; Pallas double-buffers it, which keeps us comfortably
        # inside the scoped-VMEM default on v5e/v6e and v7x's smaller VMEM.
        budget_bytes = 8 * 1024 * 1024
        tl = (budget_bytes // (tn * C * itemsize)) // 128 * 128
        tl = max(tl, 128)  # pathologically huge C would additionally need C tiling
        tile_l = L if L <= tl else tl
    assert tile_l == L or tile_l % 128 == 0, "tile_l must be 128-aligned or full L"

    grid = (pl.cdiv(N, tn), pl.cdiv(L, tile_l))
    kernel = functools.partial(
        _global_max_pool1d_kernel,
        length=L,
        tile_l=tile_l,
        need_mask=(L % tile_l != 0),
        fill=_max_identity(x.dtype),
    )

    out2d = pl.pallas_call(
        kernel,
        out_shape=jax.ShapeDtypeStruct((N, C), x.dtype),
        grid=grid,
        in_specs=[pl.BlockSpec((tn, C, tile_l), lambda n, l: (n, 0, l))],
        # Lane-dense output block, resident across the L (reduction) axis.
        out_specs=pl.BlockSpec((tn, C), lambda n, l: (n, 0)),
        compiler_params=pltpu.CompilerParams(
            dimension_semantics=("parallel", "arbitrary")
        ),
    )(x)

    # keepdims reshape to (N, C, 1) is free layout plumbing in the wrapper.
    return out2d[:, :, None]


if __name__ == "__main__":
    key = jax.random.PRNGKey(0)

    # Small shape consistent with the module: (batch, channels, length).
    N, C, L = 2, 4, 16
    x = jax.random.normal(key, (N, C, L), dtype=jnp.float32)

    out = global_max_pool1d(x)
    out = jax.block_until_ready(out)
    ref = jnp.max(x, axis=-1, keepdims=True)
    assert out.shape == (N, C, 1), out.shape
    assert jnp.allclose(out, ref), "mismatch vs reference (single-tile path)"

    # Also exercise the tiled-L accumulation + tail-masking path (forced tile).
    key2, _ = jax.random.split(key)
    x2 = jax.random.normal(key2, (3, 5, 200), dtype=jnp.float32)
    out2 = jax.block_until_ready(global_max_pool1d(x2, tile_l=128))
    ref2 = jnp.max(x2, axis=-1, keepdims=True)
    assert jnp.allclose(out2, ref2), "mismatch vs reference (tiled path)"

    print("KERNEL_OK")
</pallas_src>

<mosaic_0001>
module attributes {stable_mosaic.version = 11 : i64} {
  func.func @_global_max_pool1d_kernel(%arg0: i32, %arg1: i32, %arg2: memref<2x4x16xf32, #tpu.memory_space<vmem>>, %arg3: memref<2x4xf32, #tpu.memory_space<vmem>>) attributes {dimension_semantics = [#tpu.dimension_semantics<parallel>, #tpu.dimension_semantics<arbitrary>], iteration_bounds = array<i64: 1, 1>, scalar_prefetch = 0 : i64, scratch_operands = 0 : i64, tpu.core_type = #tpu.core_type<tc>, window_params = [{transform_indices = @transform_0, window_bounds = array<i64: 2, 4, 16>}, {transform_indices = @transform_1, window_bounds = array<i64: 2, 4>}]} {
    %c0 = arith.constant 0 : index
    %c0_0 = arith.constant 0 : index
    %c0_1 = arith.constant 0 : index
    %0 = vector.load %arg2[%c0, %c0_0, %c0_1] : memref<2x4x16xf32, #tpu.memory_space<vmem>>, vector<2x4x16xf32>
    %cst = arith.constant dense<0xFF800000> : vector<2x4xf32>
    %1 = vector.multi_reduction <maximumf>, %0, %cst [2] : vector<2x4x16xf32> to vector<2x4xf32>
    %c0_i32 = arith.constant 0 : i32
    %2 = arith.cmpi eq, %arg1, %c0_i32 : i32
    %3 = arith.extui %2 : i1 to i32
    %c0_i32_2 = arith.constant 0 : i32
    %4 = arith.cmpi ne, %3, %c0_i32_2 : i32
    scf.if %4 {
      %c0_5 = arith.constant 0 : index
      %c0_6 = arith.constant 0 : index
      %8 = vector.load %arg3[%c0_5, %c0_6] : memref<2x4xf32, #tpu.memory_space<vmem>>, vector<2x4xf32>
      tpu.vector_store %arg3[%c0_5, %c0_6], %1 {strides = array<i32>} : memref<2x4xf32, #tpu.memory_space<vmem>>, vector<2x4xf32>,
    } else {
    }
    %c0_i32_3 = arith.constant 0 : i32
    %5 = arith.cmpi ne, %arg1, %c0_i32_3 : i32
    %6 = arith.extui %5 : i1 to i32
    %c0_i32_4 = arith.constant 0 : i32
    %7 = arith.cmpi ne, %6, %c0_i32_4 : i32
    scf.if %7 {
      %c0_5 = arith.constant 0 : index
      %c0_6 = arith.constant 0 : index
      %8 = vector.load %arg3[%c0_5, %c0_6] : memref<2x4xf32, #tpu.memory_space<vmem>>, vector<2x4xf32>
      %9 = arith.maximumf %8, %1 : vector<2x4xf32>
      %c0_7 = arith.constant 0 : index
      %c0_8 = arith.constant 0 : index
      %10 = vector.load %arg3[%c0_7, %c0_8] : memref<2x4xf32, #tpu.memory_space<vmem>>, vector<2x4xf32>
      tpu.vector_store %arg3[%c0_7, %c0_8], %9 {strides = array<i32>} : memref<2x4xf32, #tpu.memory_space<vmem>>, vector<2x4xf32>,
    } else {
    }
    return
  }
  func.func @transform_0(%arg0: i32, %arg1: i32) -> (i32, i32, i32) {
    %c0_i32 = arith.constant 0 : i32
    %c0_i32_0 = arith.constant 0 : i32
    return %arg0, %c0_i32, %arg1 : i32, i32, i32
  }
  func.func @transform_1(%arg0: i32, %arg1: i32) -> (i32, i32) {
    %c0_i32 = arith.constant 0 : i32
    %c0_i32_0 = arith.constant 0 : i32
    return %arg0, %c0_i32 : i32, i32
  }
}

</mosaic_0001>

<bundles_post_ra>
// kernel: tpu_custom_call.1
= control target key start
LH: loop header
LB: loop body
LE: loop exit
PB: predicated region body
PF: predicated region fallthrough
CT: control target
= control target key end

     0   :  { %6 = vsyncpa [#allocation3], 0  ;;  %s159_s0 = inlined_call_operand.hbm [shape: f32[2,4,16], index: 0, kind: input, shape index: {}]   ;;  %s160_s1 = inlined_call_operand.hbm [shape: f32[2,4], index: 1, kind: output, shape index: {}]  }
   0x1   :  { %7 = vsyncpa [#allocation4], 0  ;;  %s12_s8 = sshll.u32 %s159_s0, 4  ;;  %s139_s9 = smov [#allocation2]   ;;  %s13_s8 = int_to_ptr.hbm [resolvable:$true] %s12_s8 }
   0x2   :  { %s14_s10 = sshll.u32 %s139_s9, 4  ;;  %s140_s11 = smov 64   ;;  %s15_s10 = int_to_ptr.vmem [resolvable:$true] %s14_s10 }
   0x3   :  { %s141_s12 = smov 4  }
   0x4   :  { %20 = dma.hbm_to_vmem [thread:$0]  %s13_s8, 128, %s15_s10, [#allocation3], %s140_s11, %s140_s11, %s141_s12  }
   0x5   :  { %135 = dma.done.wait [#allocation3], 128  }
   0x6   :  { %136 = vsyncadd [#allocation3], 4294967168  ;;  %vm27_vm0 = vcmask 125952   ;;  %v25_v0 = vld [vmem:[#allocation2] sm:$0xf]  ;;  %v40_v5 = vlaneseq  ;;  %s142_s0 = smov [#allocation5]  }
   0x7   :  { %v28_v1 = vsel %vm27_vm0, %v25_v0, -inf  ;;  %v26_v2 = vld [vmem:[#allocation2 + $0x4] sm:$0xf]  ;;  %s71_s13 = sshll.u32 %s142_s0, 4  ;;  %s73_s16 = sshll.u32 %s160_s1, 4  ;;  %vm44_vm1 = vcmask 1041409   ;;  %s72_s13 = int_to_ptr.vmem [resolvable:$true] %s71_s13  ;;  %s74_s16 = int_to_ptr.hbm [resolvable:$true] %s73_s16 }
   0x8   :  { %29 = vmax.xlane.f32.xlu0 %v28_v1  ;;  %v31_v3 = vsel %vm27_vm0, %v26_v2, -inf  ;;  %v41_v6 = vand.u32 127, %v40_v5  ;;  %vm47_vm2 = vcmask 25600  }
  0x10   :  { %32 = vmax.xlane.f32.xlu0 %v31_v3 }
  0x7b   :  { %v30_v4 = vpop.xlane.xlu0 %29 }
  0x7c   :  { %v42_v8 = vperm.slane %v30_v4, %v41_v6 }
  0x83   :  { %v33_v7 = vpop.xlane.xlu0 %32 }
  0x84   :  { %v43_v9 = vperm.slane %v33_v7, %v41_v6 }
  0x86   :  { %v45_v10 = vsel %vm44_vm1, %v43_v9, %v42_v8 }
  0x87   :  { %48 = vst.msk [vmem:[#allocation5] sm:$0x3] %vm47_vm2, %v45_v10 }
  0x88   :  { %76 = dma.vmem_to_hbm [thread:$0]  %s72_s13, 32, %s74_s16, [#allocation4]  }
  0x89   :  { %137 = dma.done.wait [#allocation4], 32  }
  0x8a   :  { %138 = vsyncadd [#allocation4], 4294967264 }
  0x8b   :  { %81 = vsyncpa [#allocation3], 1 }
  0x8c   :  { %82 = vsyncpa [#allocation4], 1 }

</bundles_post_ra>
